<compile_context>
chip_gen: v6e
topology: v6e:2x2x1
jax: 0.10.0
libtpu: 0.0.40
codegen_flags: <defaults>
</compile_context>

<pallas_src>
import functools
import math

import jax
import jax.numpy as jnp
from jax.experimental import pallas as pl
from jax.experimental.pallas import tpu as pltpu  # noqa: F401  (TPU backend import)


def _round_up(n, m):
    return (n + m - 1) // m * m


# ---------------------------------------------------------------------------
# Fused Pallas kernel: the whole Base_MLP_Network forward in one launch
# ---------------------------------------------------------------------------
def _fused_mlp_kernel(x_ref, lab_ref, noise_ref, wx_ref, wlb_ref, o_ref, *,
                      row_offsets, row_sizes, slot, out_last,
                      negative_slope, noise_mean, noise_stds):
    num_layers = len(row_sizes)

    # ONE MXU matmul covers every layer's label projection AND bias:
    #   lab_ref = [one_hot | 1]  (B, C+1)
    #   wlb_ref = [[Wl_0 .. Wl_{L-1}], [b_0 .. b_{L-1}]]  (C+1, L*slot), each layer
    # zero-padded to its own 128-lane slot, so per layer we take an aligned slice.
    lab_all = jnp.dot(lab_ref[...], wlb_ref[...],
                      preferred_element_type=jnp.float32)          # (B, L*slot)

    h = x_ref[...]                                                 # (B, pad_in0) f32
    for i in range(num_layers):
        r0, rn = row_offsets[i], row_sizes[i]

        # Gaussian noise add (VPU).  Segment starts are multiples of 128 lanes, so
        # this is a clean aligned vreg load.  Noise landing on zero-padded weight
        # rows contributes exactly nothing.
        xn = h + (noise_mean + noise_stds[i] * noise_ref[:, r0:r0 + rn])

        # bf16 MXU matmul, f32 accumulation (elementwise math stays f32 for v5e).
        z = jnp.dot(xn.astype(jnp.bfloat16), wx_ref[r0:r0 + rn, :],
                    preferred_element_type=jnp.float32)            # (B, slot)
        z = z + lab_all[:, i * slot:(i + 1) * slot]                # fused Wl + bias

        if i == num_layers - 1:
            # Numerically stable sigmoid: one EUP exp, one divide, one select.
            e = jnp.exp(-jnp.abs(z))
            r = 1.0 / (1.0 + e)
            h = jnp.where(z >= 0, r, e * r)                        # Sigmoid
        else:
            h = jnp.where(z > 0, z, negative_slope * z)            # LeakyReLU

    o_ref[...] = h[:, :out_last].astype(o_ref.dtype)


def fused_mlp_forward(x_pad, lab_ext, noise, wx_all, wlb, *, row_offsets,
                      row_sizes, slot, out_last, negative_slope, noise_mean,
                      noise_stds):
    """Single fused pallas_call covering every layer of the MLP.

    x_pad:   (B, pad_in0)            f32 flattened input, zero-padded to 128 lanes
    lab_ext: (B, C+1)                f32 [one_hot | 1]  (ones column folds the bias)
    noise:   (B, sum(row_sizes))     f32 std-normal, 128-aligned per-layer segments
    wx_all:  (sum(row_sizes), slot)  bf16 packed per-layer input weights (zero-padded)
    wlb:     (C+1, L*slot)           f32 packed per-layer label weights + biases
    """
    B = x_pad.shape[0]
    num_layers = len(row_sizes)

    kernel = functools.partial(
        _fused_mlp_kernel,
        row_offsets=tuple(row_offsets), row_sizes=tuple(row_sizes),
        slot=slot, out_last=out_last,
        negative_slope=negative_slope, noise_mean=noise_mean,
        noise_stds=tuple(noise_stds))

    def whole(a):
        nd = a.ndim
        return pl.BlockSpec(a.shape, lambda: (0,) * nd)

    in_specs = [whole(x_pad), whole(lab_ext), whole(noise), whole(wx_all), whole(wlb)]
    out_spec = pl.BlockSpec((B, out_last), lambda: (0, 0))

    # Advisory cost estimate so XLA schedules the tiny custom call sensibly.
    flops = 2 * B * lab_ext.shape[1] * wlb.shape[1]
    for rn in row_sizes:
        flops += 2 * B * rn * slot
    bytes_accessed = ((x_pad.size + lab_ext.size + noise.size + wlb.size
                       + B * out_last) * 4 + wx_all.size * 2)
    cost = pl.CostEstimate(flops=int(flops),
                           transcendentals=int(B * slot),
                           bytes_accessed=int(bytes_accessed))

    # NOTE: no grid / compiler_params needed here (single grid point, <1 MiB VMEM).
    # When scaling up, add a batch grid axis with dimension_semantics=("parallel",)
    # and set pltpu.CompilerParams(vmem_limit_bytes=...) per the header comments.
    return pl.pallas_call(
        kernel,
        out_shape=jax.ShapeDtypeStruct((B, out_last), jnp.float32),
        in_specs=in_specs,
        out_specs=out_spec,
        cost_estimate=cost,
    )(x_pad, lab_ext, noise, wx_all, wlb)


# ---------------------------------------------------------------------------
# Base_MLP_Network in JAX; the entire layer stack runs in one Pallas kernel
# ---------------------------------------------------------------------------
class BaseMLPNetwork:
    def __init__(self, input_dim, num_classes, out_dim_list, *, activation_parameter,
                 noise_mean, noise_input_std, noise_hidden_std, key):
        self.input_dim = input_dim
        self.num_classes = num_classes
        self.out_dim_list = list(out_dim_list)
        self.activation_parameter = float(activation_parameter)
        self.noise_mean = float(noise_mean)
        self.noise_input_std = float(noise_input_std)
        self.noise_hidden_std = float(noise_hidden_std)

        L = len(self.out_dim_list)
        self.in_dims = tuple([input_dim] + self.out_dim_list[:-1])
        self.noise_stds = tuple(
            self.noise_input_std if i == 0 else self.noise_hidden_std
            for i in range(L))

        # 128-lane padded layout (done ONCE at init, never per forward).
        self.slot = max(_round_up(d, 128) for d in self.out_dim_list)
        self.pad_in0 = _round_up(input_dim, 128)
        self.row_sizes = tuple([self.pad_in0] + [self.slot] * (L - 1))
        offs, acc = [], 0
        for rn in self.row_sizes:
            offs.append(acc)
            acc += rn
        self.row_offsets = tuple(offs)
        self.total_rows = acc

        # Deterministic parameter init (PyTorch Linear-style uniform(+-1/sqrt(fan_in))).
        # weight_norm at init is identity w.r.t. the forward, so plain (w, b).
        self.torch_params = []   # original (Dout, Din+C) layout (used by the reference)
        wx_all = jnp.zeros((self.total_rows, self.slot), jnp.float32)
        wlb = jnp.zeros((num_classes + 1, L * self.slot), jnp.float32)
        in_dim = input_dim
        for i, out_dim in enumerate(self.out_dim_list):
            fan_in = in_dim + num_classes
            key, kw, kb = jax.random.split(key, 3)
            bound = 1.0 / math.sqrt(fan_in)
            w = jax.random.uniform(kw, (out_dim, fan_in), jnp.float32, -bound, bound)
            b = jax.random.uniform(kb, (out_dim,), jnp.float32, -bound, bound)
            self.torch_params.append((w, b))

            r0 = self.row_offsets[i]
            c0 = i * self.slot
            wx_all = wx_all.at[r0:r0 + in_dim, :out_dim].set(jnp.transpose(w[:, :in_dim]))
            wlb = wlb.at[:num_classes, c0:c0 + out_dim].set(jnp.transpose(w[:, in_dim:]))
            wlb = wlb.at[num_classes, c0:c0 + out_dim].set(b)
            in_dim = out_dim

        # bf16 MXU operands for the large per-layer input weights (f32 accumulation
        # in-kernel); the tiny label/bias pack stays f32 (one-hot selection is exact).
        self.wx_all = wx_all.astype(jnp.bfloat16)
        self.wlb = wlb

        pad_in0 = self.pad_in0
        total_rows = self.total_rows
        cfg = dict(row_offsets=self.row_offsets, row_sizes=self.row_sizes,
                   slot=self.slot, out_last=self.out_dim_list[-1],
                   negative_slope=self.activation_parameter,
                   noise_mean=self.noise_mean, noise_stds=self.noise_stds)

        def _forward(wx_all_p, wlb_p, x, y_one_hot, noise_key):
            B = x.shape[0]
            x_flat = x.reshape(B, -1).astype(jnp.float32)        # Flatten
            x_pad = jnp.pad(x_flat, ((0, 0), (0, pad_in0 - x_flat.shape[1])))
            lab_ext = jnp.concatenate(
                [y_one_hot.astype(jnp.float32), jnp.ones((B, 1), jnp.float32)], axis=1)
            # One standard-normal draw for all layers (128-aligned segments),
            # scaled per layer in-kernel.
            noise = jax.random.normal(noise_key, (B, total_rows), jnp.float32)
            return fused_mlp_forward(x_pad, lab_ext, noise, wx_all_p, wlb_p, **cfg)

        self._forward = jax.jit(_forward)

    def __call__(self, x, y_one_hot, noise_key):
        return self._forward(self.wx_all, self.wlb, x, y_one_hot, noise_key)


# ---------------------------------------------------------------------------
# References
# ---------------------------------------------------------------------------
def reference_forward_f32(net, x, y_one_hot, noise_key):
    """Faithful f32 module math (concat -> Linear -> act), same noise stream."""
    B = x.shape[0]
    out = x.reshape(B, -1).astype(jnp.float32)
    y = y_one_hot.astype(jnp.float32)
    noise = jax.random.normal(noise_key, (B, net.total_rows), jnp.float32)
    L = len(net.out_dim_list)
    for i, (w, b) in enumerate(net.torch_params):
        d = net.in_dims[i]
        r0 = net.row_offsets[i]
        nz = net.noise_mean + net.noise_stds[i] * noise[:, r0:r0 + d]
        h = jnp.concatenate([out + nz, y], axis=1) @ w.T + b
        out = jax.nn.sigmoid(h) if i == L - 1 else jnp.where(
            h > 0, h, net.activation_parameter * h)
    return out


def reference_forward_packed(net, x, y_one_hot, noise_key):
    """Pure-JAX mirror of the kernel's packed/bf16 math (tight comparison)."""
    B = x.shape[0]
    x_flat = x.reshape(B, -1).astype(jnp.float32)
    x_pad = jnp.pad(x_flat, ((0, 0), (0, net.pad_in0 - x_flat.shape[1])))
    lab_ext = jnp.concatenate(
        [y_one_hot.astype(jnp.float32), jnp.ones((B, 1), jnp.float32)], axis=1)
    noise = jax.random.normal(noise_key, (B, net.total_rows), jnp.float32)
    lab_all = lab_ext @ net.wlb
    h = x_pad
    L = len(net.out_dim_list)
    for i in range(L):
        r0, rn = net.row_offsets[i], net.row_sizes[i]
        xn = h + (net.noise_mean + net.noise_stds[i] * noise[:, r0:r0 + rn])
        z = jnp.dot(xn.astype(jnp.bfloat16), net.wx_all[r0:r0 + rn, :],
                    preferred_element_type=jnp.float32)
        z = z + lab_all[:, i * net.slot:(i + 1) * net.slot]
        h = jax.nn.sigmoid(z) if i == L - 1 else jnp.where(
            z > 0, z, net.activation_parameter * z)
    return h[:, :net.out_dim_list[-1]]


if __name__ == "__main__":
    key = jax.random.PRNGKey(0)
    k_param, k_x, k_lbl, k_noise = jax.random.split(key, 4)

    # Small shapes: x is NCHW (B=2, C=4, H=16, W=16) -> input_dim = 1024
    B, C, H, W = 2, 4, 16, 16
    input_dim = C * H * W
    num_classes = 8
    out_dim_list = [32, 32, 1]

    net = BaseMLPNetwork(
        input_dim=input_dim,
        num_classes=num_classes,
        out_dim_list=out_dim_list,
        activation_parameter=0.2,
        noise_mean=0.0,
        noise_input_std=0.3,
        noise_hidden_std=0.5,
        key=k_param,
    )

    x = jax.random.normal(k_x, (B, C, H, W), jnp.float32)
    labels = jax.random.randint(k_lbl, (B,), 0, num_classes)
    y_one_hot = jax.nn.one_hot(labels, num_classes, dtype=jnp.float32)

    out = net(x, y_one_hot, k_noise)
    out = jax.block_until_ready(out)
    assert out.shape == (B, out_dim_list[-1]), out.shape

    # Tight check against the pure-JAX mirror of the kernel's packed/bf16 math.
    ref_packed = reference_forward_packed(net, x, y_one_hot, k_noise)
    assert jnp.allclose(out, ref_packed, atol=1e-3, rtol=1e-3), (out, ref_packed)

    # Loose check against the faithful f32 module math (bf16 weights => ~1e-2 slack).
    ref_f32 = reference_forward_f32(net, x, y_one_hot, k_noise)
    assert jnp.allclose(out, ref_f32, atol=5e-2, rtol=5e-2), (out, ref_f32)

    print("KERNEL_OK")
</pallas_src>

<mosaic_0001>
module attributes {stable_mosaic.version = 11 : i64} {
  func.func @_fused_mlp_kernel(%arg0: memref<2x1024xf32, #tpu.memory_space<vmem>>, %arg1: memref<2x9xf32, #tpu.memory_space<vmem>>, %arg2: memref<2x1280xf32, #tpu.memory_space<vmem>>, %arg3: memref<1280x128xbf16, #tpu.memory_space<vmem>>, %arg4: memref<9x384xf32, #tpu.memory_space<vmem>>, %arg5: memref<2x1xf32, #tpu.memory_space<vmem>>) attributes {dimension_semantics = [], scalar_prefetch = 0 : i64, scratch_operands = 0 : i64, tpu.core_type = #tpu.core_type<tc>} {
    %c0 = arith.constant 0 : index
    %c0_0 = arith.constant 0 : index
    %0 = vector.load %arg1[%c0, %c0_0] : memref<2x9xf32, #tpu.memory_space<vmem>>, vector<2x9xf32>
    %c0_1 = arith.constant 0 : index
    %c0_2 = arith.constant 0 : index
    %1 = vector.load %arg4[%c0_1, %c0_2] : memref<9x384xf32, #tpu.memory_space<vmem>>, vector<9x384xf32>
    %cst = arith.constant dense<0.000000e+00> : vector<2x384xf32>
    %2 = tpu.matmul %0, %1, %cst {dimension_numbers = #tpu.dot_dimension_numbers<[1], [0], [0], [1], [0, 0, 1, 1], [], []>} : vector<2x9xf32>, vector<9x384xf32>, vector<2x384xf32> -> vector<2x384xf32>
    %c0_3 = arith.constant 0 : index
    %c0_4 = arith.constant 0 : index
    %3 = vector.load %arg0[%c0_3, %c0_4] : memref<2x1024xf32, #tpu.memory_space<vmem>>, vector<2x1024xf32>
    %c0_5 = arith.constant 0 : index
    %c0_6 = arith.constant 0 : index
    %4 = vector.load %arg2[%c0_5, %c0_6] : memref<2x1280xf32, #tpu.memory_space<vmem>>, vector<2x1024xf32>
    %cst_7 = arith.constant 3.000000e-01 : f32
    %5 = vector.broadcast %cst_7 : f32 to vector<2x1024xf32>
    %6 = arith.mulf %5, %4 : vector<2x1024xf32>
    %cst_8 = arith.constant 0.000000e+00 : f32
    %7 = vector.broadcast %cst_8 : f32 to vector<2x1024xf32>
    %8 = arith.addf %7, %6 : vector<2x1024xf32>
    %9 = arith.addf %3, %8 : vector<2x1024xf32>
    %10 = arith.truncf %9 : vector<2x1024xf32> to vector<2x1024xbf16>
    %c0_9 = arith.constant 0 : index
    %c0_10 = arith.constant 0 : index
    %11 = vector.load %arg3[%c0_9, %c0_10] : memref<1280x128xbf16, #tpu.memory_space<vmem>>, vector<1024x128xbf16>
    %cst_11 = arith.constant dense<0.000000e+00> : vector<2x128xf32>
    %12 = tpu.matmul %10, %11, %cst_11 {dimension_numbers = #tpu.dot_dimension_numbers<[1], [0], [0], [1], [0, 0, 1, 1], [], []>} : vector<2x1024xbf16>, vector<1024x128xbf16>, vector<2x128xf32> -> vector<2x128xf32>
    %13 = vector.extract_strided_slice %2 {offsets = [0, 0], sizes = [2, 128], strides = [1, 1]} : vector<2x384xf32> to vector<2x128xf32>
    %14 = arith.addf %12, %13 : vector<2x128xf32>
    %cst_12 = arith.constant 0.000000e+00 : f32
    %15 = vector.broadcast %cst_12 : f32 to vector<2x128xf32>
    %16 = arith.cmpf ogt, %14, %15 : vector<2x128xf32>
    %cst_13 = arith.constant 2.000000e-01 : f32
    %17 = vector.broadcast %cst_13 : f32 to vector<2x128xf32>
    %18 = arith.mulf %17, %14 : vector<2x128xf32>
    %19 = arith.select %16, %14, %18 : vector<2x128xi1>, vector<2x128xf32>
    %c0_14 = arith.constant 0 : index
    %c1024 = arith.constant 1024 : index
    %20 = vector.load %arg2[%c0_14, %c1024] : memref<2x1280xf32, #tpu.memory_space<vmem>>, vector<2x128xf32>
    %cst_15 = arith.constant 5.000000e-01 : f32
    %21 = vector.broadcast %cst_15 : f32 to vector<2x128xf32>
    %22 = arith.mulf %21, %20 : vector<2x128xf32>
    %cst_16 = arith.constant 0.000000e+00 : f32
    %23 = vector.broadcast %cst_16 : f32 to vector<2x128xf32>
    %24 = arith.addf %23, %22 : vector<2x128xf32>
    %25 = arith.addf %19, %24 : vector<2x128xf32>
    %26 = arith.truncf %25 : vector<2x128xf32> to vector<2x128xbf16>
    %c1024_17 = arith.constant 1024 : index
    %c0_18 = arith.constant 0 : index
    %27 = vector.load %arg3[%c1024_17, %c0_18] : memref<1280x128xbf16, #tpu.memory_space<vmem>>, vector<128x128xbf16>
    %cst_19 = arith.constant dense<0.000000e+00> : vector<2x128xf32>
    %28 = tpu.matmul %26, %27, %cst_19 {dimension_numbers = #tpu.dot_dimension_numbers<[1], [0], [0], [1], [0, 0, 1, 1], [], []>} : vector<2x128xbf16>, vector<128x128xbf16>, vector<2x128xf32> -> vector<2x128xf32>
    %29 = vector.extract_strided_slice %2 {offsets = [0, 128], sizes = [2, 128], strides = [1, 1]} : vector<2x384xf32> to vector<2x128xf32>
    %30 = arith.addf %28, %29 : vector<2x128xf32>
    %cst_20 = arith.constant 0.000000e+00 : f32
    %31 = vector.broadcast %cst_20 : f32 to vector<2x128xf32>
    %32 = arith.cmpf ogt, %30, %31 : vector<2x128xf32>
    %cst_21 = arith.constant 2.000000e-01 : f32
    %33 = vector.broadcast %cst_21 : f32 to vector<2x128xf32>
    %34 = arith.mulf %33, %30 : vector<2x128xf32>
    %35 = arith.select %32, %30, %34 : vector<2x128xi1>, vector<2x128xf32>
    %c0_22 = arith.constant 0 : index
    %c1152 = arith.constant 1152 : index
    %36 = vector.load %arg2[%c0_22, %c1152] : memref<2x1280xf32, #tpu.memory_space<vmem>>, vector<2x128xf32>
    %cst_23 = arith.constant 5.000000e-01 : f32
    %37 = vector.broadcast %cst_23 : f32 to vector<2x128xf32>
    %38 = arith.mulf %37, %36 : vector<2x128xf32>
    %cst_24 = arith.constant 0.000000e+00 : f32
    %39 = vector.broadcast %cst_24 : f32 to vector<2x128xf32>
    %40 = arith.addf %39, %38 : vector<2x128xf32>
    %41 = arith.addf %35, %40 : vector<2x128xf32>
    %42 = arith.truncf %41 : vector<2x128xf32> to vector<2x128xbf16>
    %c1152_25 = arith.constant 1152 : index
    %c0_26 = arith.constant 0 : index
    %43 = vector.load %arg3[%c1152_25, %c0_26] : memref<1280x128xbf16, #tpu.memory_space<vmem>>, vector<128x128xbf16>
    %cst_27 = arith.constant dense<0.000000e+00> : vector<2x128xf32>
    %44 = tpu.matmul %42, %43, %cst_27 {dimension_numbers = #tpu.dot_dimension_numbers<[1], [0], [0], [1], [0, 0, 1, 1], [], []>} : vector<2x128xbf16>, vector<128x128xbf16>, vector<2x128xf32> -> vector<2x128xf32>
    %45 = vector.extract_strided_slice %2 {offsets = [0, 256], sizes = [2, 128], strides = [1, 1]} : vector<2x384xf32> to vector<2x128xf32>
    %46 = arith.addf %44, %45 : vector<2x128xf32>
    %47 = math.absf %46 : vector<2x128xf32>
    %cst_28 = arith.constant 0.000000e+00 : f32
    %48 = vector.broadcast %cst_28 : f32 to vector<2x128xf32>
    %49 = arith.subf %48, %47 : vector<2x128xf32>
    %50 = math.exp %49 : vector<2x128xf32>
    %cst_29 = arith.constant 1.000000e+00 : f32
    %51 = vector.broadcast %cst_29 : f32 to vector<2x128xf32>
    %52 = arith.addf %51, %50 : vector<2x128xf32>
    %cst_30 = arith.constant 1.000000e+00 : f32
    %53 = vector.broadcast %cst_30 : f32 to vector<2x128xf32>
    %54 = arith.divf %53, %52 : vector<2x128xf32>
    %cst_31 = arith.constant 0.000000e+00 : f32
    %55 = vector.broadcast %cst_31 : f32 to vector<2x128xf32>
    %56 = arith.cmpf oge, %46, %55 : vector<2x128xf32>
    %57 = arith.mulf %50, %54 : vector<2x128xf32>
    %58 = arith.select %56, %54, %57 : vector<2x128xi1>, vector<2x128xf32>
    %59 = vector.extract_strided_slice %58 {offsets = [0, 0], sizes = [2, 1], strides = [1, 1]} : vector<2x128xf32> to vector<2x1xf32>
    %c0_32 = arith.constant 0 : index
    %c0_33 = arith.constant 0 : index
    %60 = vector.load %arg5[%c0_32, %c0_33] : memref<2x1xf32, #tpu.memory_space<vmem>>, vector<2x1xf32>
    tpu.vector_store %arg5[%c0_32, %c0_33], %59 {strides = array<i32>} : memref<2x1xf32, #tpu.memory_space<vmem>>, vector<2x1xf32>,
    return
  }
}

</mosaic_0001>

<bundles_post_ra>
// kernel: _forward.1
= control target key start
LH: loop header
LB: loop body
LE: loop exit
PB: predicated region body
PF: predicated region fallthrough
CT: control target
= control target key end

     0   :  { %10 = vsyncpa [#allocation3], 0  ;;  %s1525_s18 = smov [#allocation2]   ;;  %s1637_s0 = inlined_call_operand.vmem [shape: f32[2,1024], index: 0, kind: input, shape index: {}]   ;;  %s1638_s1 = inlined_call_operand.vmem [shape: f32[2,9], index: 1, kind: input, shape index: {}]   ;;  %s1639_s2 = inlined_call_operand.vmem [shape: f32[2,1280], index: 2, kind: input, shape index: {}]   ;;  %s1640_s3 = inlined_call_operand.hbm [shape: bf16[1280,128], index: 3, kind: input, shape index: {}]   ;;  %s1641_s4 = inlined_call_operand.vmem [shape: f32[9,384], index: 4, kind: input, shape index: {}]   ;;  %s1642_s5 = inlined_call_operand.vmem [shape: f32[2,1], index: 5, kind: output, shape index: {}]  }
   0x1   :  { %s22_s19 = sshll.u32 %s1525_s18, 4  ;;  %s23_s19 = int_to_ptr.vmem [resolvable:$true] %s22_s19 }
   0x2   :  { %s1511_s20 = scalar_lea.vmem %s23_s19, 10240  ;;  %p1516_p1 = scmp.lt.s32.totalorder %s23_s19, %s23_s19 }
   0x3   :  { %p1512_p0 = scmp.ne.s32.totalorder %s23_s19, %s1511_s20  ;;  %p1517_p2 = scmp.lt.s32.totalorder %s1511_s20, %s1511_s20 }
   0x5   :  { %p1518_p3 = por %p1517_p2, %p1516_p1 }
   0x7   :  { %p1519_p4 = pnand %p1518_p3, %p1512_p0 }
   0x9   :  { %1522 = shalt.err (!%p1519_p4)
}
   0xa   :  { %s1526_s21 = smov 64   ;;  %s1527_s22 = smov 4  }
   0xb   :  { %28 = dma.hbm_to_vmem [thread:$0]  %s1640_s3, 10240, %s23_s19, [#allocation3], %s1526_s21, %s1526_s21, %s1527_s22  }
   0xc   :  { %1523 = dma.done.wait [#allocation3], 10240  }
   0xd   :  { %1524 = vsyncadd [#allocation3], 4294957056  ;;  %v1528_v0 = vmov 0.0   ;;  %vm1529_vm0 = vmmov 0   ;;  %vm46_vm1 = vcmask 1040384   ;;  %v37_v4 = vld [vmem:[%s1641_s4 + $0x8] sm:$0xff]  ;;  %v213_v35 = vlaneseq }
   0xe   :  { %1366 = vmatprep.subr.mxu1 %v1528_v0  ;;  %120 = vmatprep.mubr.f32.mxu0 %v1528_v0  ;;  %v40_v1 = vld [vmem:[%s1641_s4 + $0x20] sm:$0x1]  ;;  %v41_v2 = vld [vmem:[%s1641_s4 + $0x28] sm:$0x1]  ;;  %v39_v3 = vld [vmem:[%s1641_s4 + $0x18] sm:$0x1] }
   0xf   :  { %1370 = vmatprep.mubr.msk.f32.mxu1 %vm1529_vm0, %v1528_v0  ;;  %1172 = vmatprep.subr.msk.mxu0 %vm46_vm1, %v40_v1  ;;  %v38_v5 = vld [vmem:[%s1641_s4 + $0x10] sm:$0xff]  ;;  %v36_v6 = vld [vmem:[%s1641_s4] sm:$0xff]  ;;  %v1419_v7 = vld [vmem:[#allocation2 + $0xf8] sm:$0xff]   ;;  %vm42_vm2 = vcmask 72704   ;;  %v1530_v33 = vmov 1983009808  }
  0x10   :  { %1367 = vmatpush3.msk.msra.mxu1 %vm46_vm1, %v41_v2  ;;  %1173 = vmatpush1.msk.msra.mxu0 %vm46_vm1, %v39_v3  ;;  %v35_v8 = vld [vmem:[%s1638_s1] sm:$0x3]  ;;  %v1420_v9 = vld [vmem:[#allocation2 + $0x78] sm:$0xff]   ;;  %v1423_v12 = vld [vmem:[#allocation2 + $0xf0] sm:$0xff]   ;;  %v211_v34 = vunpack.c.l.s4 %v1530_v33  ;;  %v214_v41 = vshrl.u32 %v213_v35, 7  ;;  %vm1165_vm5 = vcmask 1024  }
  0x11   :  { %1368 = vmatprep.subr.mxu1 %v1528_v0  ;;  %86 = vmatprep.subr.mxu0 %v37_v4  ;;  %v1421_v10 = vld [vmem:[#allocation2 + $0xb8] sm:$0xff]   ;;  %v1424_v13 = vld [vmem:[#allocation2 + $0x70] sm:$0xff]   ;;  %v1427_v16 = vld [vmem:[#allocation2 + $0xe8] sm:$0xff]  }
  0x12   :  { %1369 = vmatpush3.msra.mxu1 %v38_v5  ;;  %87 = vmatpush1.msra.mxu0 %v36_v6  ;;  %v1422_v11 = vld [vmem:[#allocation2 + $0x38] sm:$0xff]   ;;  %v1425_v14 = vld [vmem:[#allocation2 + $0xb0] sm:$0xff]   ;;  %v1428_v17 = vld [vmem:[#allocation2 + $0x68] sm:$0xff]   ;;  %v212_v40 = vunpack.c.0.s8 %v211_v34 }
  0x13   :  { %1282 = vmatprep.subr.bf16.mxu1 %v1419_v7  ;;  %1174 = vmatmul.mubr.msk.f32.vlgmr.msra.gmra.mxu0 %vm42_vm2, %v35_v8  ;;  %v1426_v15 = vld [vmem:[#allocation2 + $0x30] sm:$0xff]   ;;  %v1429_v18 = vld [vmem:[#allocation2 + $0xa8] sm:$0xff]   ;;  %v1431_v20 = vld [vmem:[#allocation2 + $0xe0] sm:$0xff]  }
  0x14   :  { %1371 = vmatmul.mubr.msk.f32.vlgmr.msra.gmra.mxu1 %vm42_vm2, %v35_v8  ;;  %1260 = vmatprep.subr.bf16.mxu0 %v1420_v9  ;;  %v1430_v19 = vld [vmem:[#allocation2 + $0x28] sm:$0xff]   ;;  %v1432_v21 = vld [vmem:[#allocation2 + $0x60] sm:$0xff]   ;;  %v1435_v24 = vld [vmem:[#allocation2 + $0xd8] sm:$0xff]   ;;  %v1596_v48 = vsub.s32 %v212_v40, %v214_v41 }
  0x15   :  { %1283 = vmatpush3.bf16.msra.mxu1 %v1421_v10  ;;  %1261 = vmatpush3.bf16.msra.mxu0 %v1422_v11  ;;  %v1433_v22 = vld [vmem:[#allocation2 + $0xa0] sm:$0xff]   ;;  %v1436_v25 = vld [vmem:[#allocation2 + $0x58] sm:$0xff]   ;;  %v1439_v28 = vld [vmem:[#allocation2 + $0xd0] sm:$0xff]  }
  0x16   :  { %1284 = vmatprep.subr.bf16.mxu1 %v1423_v12  ;;  %1262 = vmatprep.subr.bf16.mxu0 %v1424_v13  ;;  %v1434_v23 = vld [vmem:[#allocation2 + $0x20] sm:$0xff]   ;;  %v1437_v26 = vld [vmem:[#allocation2 + $0x98] sm:$0xff]   ;;  %v1440_v29 = vld [vmem:[#allocation2 + $0x50] sm:$0xff]  }
  0x17   :  { %v1438_v27 = vld [vmem:[#allocation2 + $0x18] sm:$0xff]   ;;  %v1441_v30 = vld [vmem:[#allocation2 + $0x90] sm:$0xff]   ;;  %v1443_v32 = vld [vmem:[#allocation2 + $0xc8] sm:$0xff]  }
  0x18   :  { %v1442_v31 = vld [vmem:[#allocation2 + $0x10] sm:$0xff]   ;;  %v1444_v36 = vld [vmem:[#allocation2 + $0x48] sm:$0xff]   ;;  %v1447_v39 = vld [vmem:[#allocation2 + $0xc0] sm:$0xff]  }
  0x19   :  { %1285 = vmatpush3.bf16.msra.mxu1 %v1425_v14  ;;  %1263 = vmatpush3.bf16.msra.mxu0 %v1426_v15  ;;  %v1445_v37 = vld [vmem:[#allocation2 + $0x88] sm:$0xff]   ;;  %v1448_v42 = vld [vmem:[#allocation2 + $0x40] sm:$0xff]   ;;  %v1451_v49 = vld [vmem:[#allocation2 + $0x1f8] sm:$0xff]  }
  0x1a   :  { %1286 = vmatprep.subr.bf16.mxu1 %v1427_v16  ;;  %1264 = vmatprep.subr.bf16.mxu0 %v1428_v17  ;;  %v1446_v38 = vld [vmem:[#allocation2 + $0x8] sm:$0xff]   ;;  %v1449_v43 = vld [vmem:[#allocation2 + $0x80] sm:$0xff]   ;;  %v1452_v51 = vld [vmem:[#allocation2 + $0x178] sm:$0xff]  }
  0x1b   :  { %v1450_v44 = vld [vmem:[#allocation2] sm:$0xff]   ;;  %v1454_v59 = vld [vmem:[#allocation2 + $0x138] sm:$0xff]   ;;  %v1456_v61 = vld [vmem:[#allocation2 + $0x170] sm:$0xff]  }
  0x1c   :  { %v197_v45 = vld [vmem:[%s1637_s0] sm:$0xff]  ;;  %v1453_v63 = vld [vmem:[#allocation2 + $0x1b8] sm:$0xff]   ;;  %v1455_v1 = vld [vmem:[#allocation2 + $0x1f0] sm:$0xff]  }
  0x1d   :  { %1287 = vmatpush3.bf16.msra.mxu1 %v1429_v18  ;;  %1265 = vmatpush3.bf16.msra.mxu0 %v1430_v19  ;;  %v199_v46 = vld [vmem:[%s1639_s2] sm:$0xff]  ;;  %v1458_v2 = vld [vmem:[#allocation2 + $0x130] sm:$0xff]   ;;  %v1460_v3 = vld [vmem:[#allocation2 + $0x168] sm:$0xff]  }
  0x1e   :  { %1288 = vmatprep.subr.bf16.mxu1 %v1431_v20  ;;  %1266 = vmatprep.subr.bf16.mxu0 %v1432_v21  ;;  %v201_v47 = vmul.f32 0.3, %v199_v46  ;;  %v1457_v4 = vld [vmem:[#allocation2 + $0x1b0] sm:$0xff]   ;;  %v1459_v5 = vld [vmem:[#allocation2 + $0x1e8] sm:$0xff]   ;;  %v1464_v7 = vld [vmem:[#allocation2 + $0x160] sm:$0xff]  }
  0x1f   :  { %v1462_v6 = vld [vmem:[#allocation2 + $0x128] sm:$0xff]   ;;  %v1463_v9 = vld [vmem:[#allocation2 + $0x1e0] sm:$0xff]   ;;  %v1468_v11 = vld [vmem:[#allocation2 + $0x158] sm:$0xff]  }
  0x20   :  { %v205_v50 = vadd.f32 %v201_v47, %v197_v45  ;;  %v1461_v8 = vld [vmem:[#allocation2 + $0x1a8] sm:$0xff]   ;;  %v1466_v10 = vld [vmem:[#allocation2 + $0x120] sm:$0xff]   ;;  %v1467_v13 = vld [vmem:[#allocation2 + $0x1d8] sm:$0xff]  }
  0x21   :  { %1289 = vmatpush3.bf16.msra.mxu1 %v1433_v22  ;;  %1267 = vmatpush3.bf16.msra.mxu0 %v1434_v23  ;;  %v1465_v12 = vld [vmem:[#allocation2 + $0x1a0] sm:$0xff]   ;;  %v1470_v14 = vld [vmem:[#allocation2 + $0x118] sm:$0xff]   ;;  %v1472_v15 = vld [vmem:[#allocation2 + $0x150] sm:$0xff]  }
  0x22   :  { %1290 = vmatprep.subr.bf16.mxu1 %v1435_v24  ;;  %1268 = vmatprep.subr.bf16.mxu0 %v1436_v25  ;;  %v209_v52 = vcombine.high %v205_v50, %v205_v50  ;;  %v216_v53 = vrot.slane %v205_v50, %v1596_v48  ;;  %v1469_v16 = vld [vmem:[#allocation2 + $0x198] sm:$0xff]   ;;  %v1471_v17 = vld [vmem:[#allocation2 + $0x1d0] sm:$0xff]   ;;  %v1476_v20 = vld [vmem:[#allocation2 + $0x148] sm:$0xff]  }
  0x23   :  { %v1473_v18 = vld [vmem:[#allocation2 + $0x190] sm:$0xff]   ;;  %v1475_v21 = vld [vmem:[#allocation2 + $0x1c8] sm:$0xff]   ;;  %v1480_v24 = vld [vmem:[#allocation2 + $0x140] sm:$0xff]  }
  0x24   :  { %v223_v54 = vrot.slane %v209_v52, %v1596_v48  ;;  %v224_v55 = vcombine.high %v216_v53, %v216_v53  ;;  %v251_v56 = vpack.c.bf16 %v216_v53, %v216_v53  ;;  %v1474_v19 = vld [vmem:[#allocation2 + $0x110] sm:$0xff]   ;;  %v1478_v22 = vld [vmem:[#allocation2 + $0x108] sm:$0xff]   ;;  %v1483_v41 = vld [vmem:[#allocation2 + $0x238] sm:$0xff]  }
  0x25   :  { %1291 = vmatpush3.bf16.msra.mxu1 %v1437_v26  ;;  %1269 = vmatpush3.bf16.msra.mxu0 %v1438_v27  ;;  %v1477_v23 = vld [vmem:[#allocation2 + $0x188] sm:$0xff]   ;;  %v1479_v27 = vld [vmem:[#allocation2 + $0x1c0] sm:$0xff]   ;;  %v1487_v45 = vld [vmem:[#allocation2 + $0x218] sm:$0xff]  }
  0x26   :  { %1292 = vmatprep.subr.bf16.mxu1 %v1439_v28  ;;  %1270 = vmatprep.subr.bf16.mxu0 %v1440_v29  ;;  %v225_v57 = vcombine.high %v223_v54, %v223_v54  ;;  %v252_v58 = vpack.c.bf16 %v224_v55, %v224_v55  ;;  %v253_v60 = vpack.c.bf16 %v223_v54, %v223_v54  ;;  %v198_v25 = vld [vmem:[%s1637_s0 + $0x8] sm:$0xff]  ;;  %v1482_v29 = vld [vmem:[#allocation2 + $0x100] sm:$0xff]   ;;  %v1488_v46 = vld [vmem:[#allocation2 + $0x210] sm:$0xff]  }
  0x27   :  { %v200_v26 = vld [vmem:[%s1639_s2 + $0x8] sm:$0xff]  ;;  %v1492_v50 = vld [vmem:[#allocation2 + $0x270] sm:$0xff]   ;;  %v1494_v52 = vld [vmem:[#allocation2 + $0x260] sm:$0xff]  }
  0x28   :  { %v254_v62 = vpack.c.bf16 %v225_v57, %v225_v57  ;;  %803 = vmatprep.mubr.bf16.mxu0 %v252_v58  ;;  %v202_v28 = vmul.f32 0.3, %v200_v26  ;;  %v1489_v47 = vld [vmem:[#allocation2 + $0x208] sm:$0xff]   ;;  %v1495_v53 = vld [vmem:[#allocation2 + $0x258] sm:$0xff]   ;;  %v1496_v54 = vld [vmem:[#allocation2 + $0x250] sm:$0xff]  }
  0x29   :  { %1293 = vmatpush3.bf16.msra.mxu1 %v1441_v30  ;;  %1271 = vmatpush3.bf16.msra.mxu0 %v1442_v31  ;;  %v1481_v31 = vld [vmem:[#allocation2 + $0x180] sm:$0xff]   ;;  %v1497_v26 = vld [vmem:[#allocation2 + $0x248] sm:$0xff]  }
  0x2a   :  { %1294 = vmatprep.subr.bf16.mxu1 %v1443_v32  ;;  %1272 = vmatprep.subr.bf16.mxu0 %v1444_v36  ;;  %v206_v30 = vadd.f32 %v202_v28, %v198_v25  ;;  %v1046_v28 = vld [vmem:[%s1639_s2 + $0x12] sm:$0x3] }
  0x2b   :  { %843 = vmatprep.mubr.bf16.mxu1 %v254_v62 }
  0x2c   :  { %v226_v32 = vcombine.high %v206_v30, %v206_v30  ;;  %v233_v33 = vrot.slane %v206_v30, %v1596_v48 }
  0x2d   :  { %1295 = vmatpush3.bf16.msra.mxu1 %v1445_v37  ;;  %1273 = vmatpush3.bf16.msra.mxu0 %v1446_v38 }
  0x2e   :  { %1296 = vmatprep.subr.bf16.mxu1 %v1447_v39  ;;  %1274 = vmatprep.subr.bf16.mxu0 %v1448_v42  ;;  %v240_v34 = vrot.slane %v226_v32, %v1596_v48  ;;  %v241_v35 = vcombine.high %v233_v33, %v233_v33  ;;  %v255_v36 = vpack.c.bf16 %v233_v33, %v233_v33  ;;  %v1484_v42 = vld [vmem:[#allocation2 + $0x230] sm:$0xff]   ;;  %v1490_v48 = vld [vmem:[#allocation2 + $0x200] sm:$0xff]  }
  0x30   :  { %v242_v37 = vcombine.high %v240_v34, %v240_v34  ;;  %v256_v38 = vpack.c.bf16 %v241_v35, %v241_v35  ;;  %v257_v39 = vpack.c.bf16 %v240_v34, %v240_v34 }
  0x31   :  { %1297 = vmatpush3.bf16.msra.mxu1 %v1449_v43  ;;  %1275 = vmatpush3.bf16.msra.mxu0 %v1450_v44  ;;  %v1485_v43 = vld [vmem:[#allocation2 + $0x228] sm:$0xff]   ;;  %v1486_v44 = vld [vmem:[#allocation2 + $0x220] sm:$0xff]  }
  0x32   :  { %1326 = vmatprep.subr.bf16.mxu1 %v1451_v49  ;;  %1304 = vmatprep.subr.bf16.mxu0 %v1452_v51  ;;  %v258_v40 = vpack.c.bf16 %v242_v37, %v242_v37  ;;  %v1491_v49 = vld [vmem:[#allocation2 + $0x278] sm:$0xff]   ;;  %v1493_v51 = vld [vmem:[#allocation2 + $0x268] sm:$0xff]  }
  0x34   :  { %804 = vmatmul.mubr.bf16.vlgmr.msra.gmra.mxu0 %v251_v56  ;;  %844 = vmatmul.mubr.bf16.vlgmr.msra.gmra.mxu1 %v253_v60 }
  0x35   :  { %1305 = vmatpush3.bf16.msra.mxu0 %v1454_v59  ;;  %1327 = vmatpush3.bf16.msra.mxu1 %v1453_v63 }
  0x36   :  { %1306 = vmatprep.subr.bf16.mxu0 %v1456_v61  ;;  %1328 = vmatprep.subr.bf16.mxu1 %v1455_v1 }
  0x37   :  { %883 = vmatprep.mubr.bf16.mxu0 %v256_v38  ;;  %923 = vmatprep.mubr.bf16.mxu1 %v258_v40 }
  0x39   :  { %1307 = vmatpush3.bf16.msra.mxu0 %v1458_v2  ;;  %1329 = vmatpush3.bf16.msra.mxu1 %v1457_v4 }
  0x3a   :  { %1308 = vmatprep.subr.bf16.mxu0 %v1460_v3  ;;  %1330 = vmatprep.subr.bf16.mxu1 %v1459_v5 }
  0x3d   :  { %1309 = vmatpush3.bf16.msra.mxu0 %v1462_v6  ;;  %1331 = vmatpush3.bf16.msra.mxu1 %v1461_v8 }
  0x3e   :  { %1310 = vmatprep.subr.bf16.mxu0 %v1464_v7  ;;  %1332 = vmatprep.subr.bf16.mxu1 %v1463_v9 }
  0x41   :  { %1311 = vmatpush3.bf16.msra.mxu0 %v1466_v10  ;;  %1333 = vmatpush3.bf16.msra.mxu1 %v1465_v12 }
  0x42   :  { %1312 = vmatprep.subr.bf16.mxu0 %v1468_v11  ;;  %1334 = vmatprep.subr.bf16.mxu1 %v1467_v13 }
  0x45   :  { %1313 = vmatpush3.bf16.msra.mxu0 %v1470_v14  ;;  %1335 = vmatpush3.bf16.msra.mxu1 %v1469_v16  ;;  %v934_v16 = vld [vmem:[%s1639_s2 + $0x10] sm:$0x3] }
  0x46   :  { %1314 = vmatprep.subr.bf16.mxu0 %v1472_v15  ;;  %1336 = vmatprep.subr.bf16.mxu1 %v1471_v17 }
  0x49   :  { %1315 = vmatpush3.bf16.msra.mxu0 %v1474_v19  ;;  %1337 = vmatpush3.bf16.msra.mxu1 %v1473_v18 }
  0x4a   :  { %1316 = vmatprep.subr.bf16.mxu0 %v1476_v20  ;;  %1338 = vmatprep.subr.bf16.mxu1 %v1475_v21  ;;  %v935_v21 = vmul.f32 0.5, %v934_v16 }
  0x4d   :  { %1317 = vmatpush3.bf16.msra.mxu0 %v1478_v22  ;;  %1339 = vmatpush3.bf16.msra.mxu1 %v1477_v23 }
  0x4e   :  { %1318 = vmatprep.subr.bf16.mxu0 %v1480_v24  ;;  %1340 = vmatprep.subr.bf16.mxu1 %v1479_v27  ;;  %v1498_v27 = vld [vmem:[#allocation2 + $0x240] sm:$0xff]  }
  0x51   :  { %1319 = vmatpush3.bf16.msra.mxu0 %v1482_v29  ;;  %1341 = vmatpush3.bf16.msra.mxu1 %v1481_v31  ;;  %v1047_v31 = vmul.f32 0.5, %v1046_v28 }
  0x52   :  { %1373 = vmatprep.subr.bf16.mxu0 %v1528_v0  ;;  %1393 = vmatprep.subr.bf16.mxu1 %v1528_v0 }
  0x54   :  { %884 = vmatmul.mubr.bf16.vlgmr.msra.gmra.mxu0 %v255_v36  ;;  %924 = vmatmul.mubr.bf16.vlgmr.msra.gmra.mxu1 %v257_v39 }
  0x55   :  { %1389 = vmatprep.mubr.msk.bf16.mxu0 %vm1529_vm0, %v1528_v0  ;;  %1409 = vmatprep.mubr.msk.bf16.mxu1 %vm1529_vm0, %v1528_v0 }
  0x56   :  { %1374 = vmatpush3.bf16.msra.mxu0 %v1483_v41  ;;  %1394 = vmatpush3.bf16.msra.mxu1 %v1491_v49 }
  0x57   :  { %1375 = vmatprep.subr.bf16.mxu0 %v1528_v0  ;;  %1395 = vmatprep.subr.bf16.mxu1 %v1528_v0 }
  0x5a   :  { %1376 = vmatpush3.bf16.msra.mxu0 %v1484_v42  ;;  %1396 = vmatpush3.bf16.msra.mxu1 %v1492_v50 }
  0x5b   :  { %1377 = vmatprep.subr.bf16.mxu0 %v1528_v0  ;;  %1397 = vmatprep.subr.bf16.mxu1 %v1528_v0 }
  0x5e   :  { %1378 = vmatpush3.bf16.msra.mxu0 %v1485_v43  ;;  %1398 = vmatpush3.bf16.msra.mxu1 %v1493_v51 }
  0x5f   :  { %1379 = vmatprep.subr.bf16.mxu0 %v1528_v0  ;;  %1399 = vmatprep.subr.bf16.mxu1 %v1528_v0 }
  0x62   :  { %1380 = vmatpush3.bf16.msra.mxu0 %v1486_v44  ;;  %1400 = vmatpush3.bf16.msra.mxu1 %v1494_v52 }
  0x63   :  { %1381 = vmatprep.subr.bf16.mxu0 %v1528_v0  ;;  %1401 = vmatprep.subr.bf16.mxu1 %v1528_v0 }
  0x66   :  { %1382 = vmatpush3.bf16.msra.mxu0 %v1487_v45  ;;  %1402 = vmatpush3.bf16.msra.mxu1 %v1495_v53 }
  0x67   :  { %1383 = vmatprep.subr.bf16.mxu0 %v1528_v0  ;;  %1403 = vmatprep.subr.bf16.mxu1 %v1528_v0 }
  0x6a   :  { %1384 = vmatpush3.bf16.msra.mxu0 %v1488_v46  ;;  %1404 = vmatpush3.bf16.msra.mxu1 %v1496_v54 }
  0x6b   :  { %1385 = vmatprep.subr.bf16.mxu0 %v1528_v0  ;;  %1405 = vmatprep.subr.bf16.mxu1 %v1528_v0 }
  0x6e   :  { %1386 = vmatpush3.bf16.msra.mxu0 %v1489_v47  ;;  %1406 = vmatpush3.bf16.msra.mxu1 %v1497_v26 }
  0x6f   :  { %1387 = vmatprep.subr.bf16.mxu0 %v1528_v0  ;;  %1407 = vmatprep.subr.bf16.mxu1 %v1528_v0 }
  0x72   :  { %1388 = vmatpush3.bf16.msra.mxu0 %v1490_v48  ;;  %1408 = vmatpush3.bf16.msra.mxu1 %v1498_v27 }
  0xd3   :  { %v122_v57 = vpop.f32.mrf.mxu0 }
  0xd4   :  { %v193_v55 = vpop.f32.mrf.mxu1 }
  0xd5   :  { %v124_v58 = vpop.f32.mrf.mxu0 }
  0xd6   :  { %v1372_v56 = vpop.f32.mrf.mxu1 }
  0xf4   :  { %v1276_v59 = vpop.f32.mrf.mxu0  ;;  %v1298_v60 = vpop.f32.mrf.mxu1 }
  0xf6   :  { %v1277_v61 = vpop.f32.mrf.mxu0  ;;  %v1299_v62 = vpop.f32.mrf.mxu1 }
  0xf7   :  { %v1278_v4 = vadd.f32 %v1277_v61, %v1276_v59  ;;  %v1300_v5 = vadd.f32 %v1299_v62, %v1298_v60 }
  0xf8   :  { %v1279_v63 = vpop.f32.mrf.mxu0  ;;  %v1301_v1 = vpop.f32.mrf.mxu1 }
  0xf9   :  { %v806_v6 = vadd.f32 %v1278_v4, %v122_v57 }
  0xfa   :  { %v1280_v2 = vpop.f32.mrf.mxu0  ;;  %v1302_v3 = vpop.f32.mrf.mxu1 }
  0xfb   :  { %v846_v10 = vadd.f32 %v1300_v5, %v806_v6 }
 0x114   :  { %v1320_v7 = vpop.f32.mrf.mxu0  ;;  %v1342_v8 = vpop.f32.mrf.mxu1 }
 0x116   :  { %v1321_v9 = vpop.f32.mrf.mxu0  ;;  %v1343_v12 = vpop.f32.mrf.mxu1 }
 0x117   :  { %v1322_v11 = vadd.f32 %v1321_v9, %v1320_v7  ;;  %v1344_v14 = vadd.f32 %v1343_v12, %v1342_v8 }
 0x118   :  { %v1323_v13 = vpop.f32.mrf.mxu0  ;;  %v1345_v17 = vpop.f32.mrf.mxu1 }
 0x119   :  { %v886_v15 = vadd.f32 %v1322_v11, %v846_v10 }
 0x11a   :  { %v1324_v18 = vpop.f32.mrf.mxu0  ;;  %v1346_v20 = vpop.f32.mrf.mxu1 }
 0x11b   :  { %v926_v19 = vadd.f32 %v1344_v14, %v886_v15 }
 0x11d   :  { %vm931_vm3 = vcmp.gt.f32.partialorder %v926_v19, 0.0  ;;  %v932_v22 = vmul.f32 0.2, %v926_v19 }
 0x11f   :  { %v933_v23 = vsel %vm931_vm3, %v926_v19, %v932_v22 }
 0x120   :  { %v937_v24 = vadd.f32 %v935_v21, %v933_v23 }
 0x122   :  { %v938_v25 = vpack.c.bf16 %v937_v24, %v937_v24 }
 0x124   :  { %1390 = vmatmul.mubr.bf16.vlgmr.msra.gmra.mxu0 %v938_v25 }
 0x1e4   :  { %v1037_v29 = vpop.f32.mrf.mxu0 }
 0x1e5   :  { %v1038_v30 = vadd.f32 %v1037_v29, %v124_v58 }
 0x1e6   :  { %v1391_v32 = vpop.f32.mrf.mxu0 }
 0x1e7   :  { %vm1043_vm4 = vcmp.gt.f32.partialorder %v1038_v30, 0.0  ;;  %v1044_v33 = vmul.f32 0.2, %v1038_v30 }
 0x1e8   :  { %v1040_v34 = vpop.f32.mrf.mxu0 }
 0x1e9   :  { %v1045_v35 = vsel %vm1043_vm4, %v1038_v30, %v1044_v33 }
 0x1ea   :  { %v1049_v36 = vadd.f32 %v1047_v31, %v1045_v35  ;;  %v1392_v37 = vpop.f32.mrf.mxu0 }
 0x1ec   :  { %v1050_v38 = vpack.c.bf16 %v1049_v36, %v1049_v36 }
 0x1ee   :  { %1410 = vmatmul.mubr.bf16.vlgmr.msra.gmra.mxu1 %v1050_v38 }
 0x2ae   :  { %v1149_v39 = vpop.f32.mrf.mxu1 }
 0x2af   :  { %v1150_v0 = vadd.f32 %v1149_v39, %v193_v55 }
 0x2b0   :  { %v1411_v40 = vpop.f32.mrf.mxu1 }
 0x2b1   :  { %v1155_v41 = vand.u32 2147483647, %v1150_v0  ;;  %vm1162_vm6 = vcmp.ge.f32.partialorder %v1150_v0, 0.0 }
 0x2b2   :  { %v1152_v42 = vpop.f32.mrf.mxu1 }
 0x2b3   :  { %v1156_v43 = vsub.f32 0.0, %v1155_v41 }
 0x2b4   :  { %v1412_v44 = vpop.f32.mrf.mxu1 }
 0x2b5   :  { %v1157_v45 = vmul.f32 1.442695, %v1156_v43 }
 0x2b7   :  { %1499 = vpow2.f32 %v1157_v45 }
 0x2c4   :  { %v1500_v46 = vpop.eup %1499 }
 0x2c5   :  { %v1159_v47 = vadd.f32 1.0, %v1500_v46 }
 0x2c7   :  { %1501 = vrcp.f32 %v1159_v47 }
 0x2d4   :  { %v1502_v48 = vpop.eup %1501 }
 0x2d5   :  { %v1163_v49 = vmul.f32 %v1502_v48, %v1500_v46 }
 0x2d7   :  { %v1164_v50 = vsel %vm1162_vm6, %v1502_v48, %v1163_v49 }
 0x2d8   :  { %1166 = vst.msk [vmem:[%s1642_s5] sm:$0x3] %vm1165_vm5, %v1164_v50 }
 0x2d9   :  { %1171 = vsyncpa [#allocation3], 1 }

</bundles_post_ra>
